<compile_context>
chip_gen: v7x
topology: tpu7x:2x2x1
jax: 0.10.0
libtpu: 0.0.40
codegen_flags: <defaults>
</compile_context>

<pallas_src>
import jax
import jax.numpy as jnp
from jax.experimental import pallas as pl
from jax.experimental.pallas import tpu as pltpu


def _leaky_relu(x, slope=0.2):
    return jnp.where(x > 0, x, slope * x)


def _mlp_kernel(xt_ref, w1t_ref, b1_ref, w2t_ref, b2_ref, ot_ref):
    # Transposed layout: rows (batch) live on the 128-lane axis, tiny feature
    # dims (nc=6 -> nh=12 -> nz=4) live on sublanes.
    x = xt_ref[...].astype(jnp.float32)                       # (nc, tm)
    # Layer 1: Linear + LeakyReLU(0.2); hidden stays in VMEM/vregs.
    h = jnp.dot(w1t_ref[...].astype(jnp.float32), x,
                preferred_element_type=jnp.float32) + b1_ref[...]   # (nh, tm)
    h = _leaky_relu(h)
    # Layer 2: Linear + LeakyReLU(0.2).
    y = jnp.dot(w2t_ref[...].astype(jnp.float32), h,
                preferred_element_type=jnp.float32) + b2_ref[...]   # (nz, tm)
    ot_ref[...] = _leaky_relu(y).astype(ot_ref.dtype)


def _pick_row_tile(M):
    """Lane-axis tile size: big (128..8192, multiple of 128), but keep the
    grid >= 2 steps when possible so both v7x TensorCores get work."""
    if M <= 128:
        return M                      # single full-extent block
    tm = min(8192, max(128, (M + 1) // 2))
    return max(128, (tm // 128) * 128)


def th_encoder_forward(params, x, *, tm=None):
    """ThEncoder.forward: 2-layer MLP over the last dim, result flattened to
    (-1, nz), exactly like x.view(-1, nz)."""
    w1 = params["w1"]          # (nc, nh)
    b1 = params["b1"]          # (nh,)
    w2 = params["w2"]          # (nh, nz)
    b2 = params["b2"]          # (nz,)
    nc, nh = w1.shape
    nz = w2.shape[1]

    xf = x.reshape(-1, nc)
    M = xf.shape[0]
    xt = xf.T                                   # (nc, M): layout plumbing only
    if tm is None:
        tm = _pick_row_tile(M)
    grid = pl.cdiv(M, tm)

    out_dtype = jnp.promote_types(x.dtype, w1.dtype)

    w1t = w1.T                                  # (nh, nc)
    w2t = w2.T                                  # (nz, nh)
    b1c = b1.reshape(nh, 1).astype(jnp.float32)
    b2c = b2.reshape(nz, 1).astype(jnp.float32)

    yt = pl.pallas_call(
        _mlp_kernel,
        out_shape=jax.ShapeDtypeStruct((nz, M), out_dtype),
        grid_spec=pltpu.PrefetchScalarGridSpec(
            num_scalar_prefetch=0,
            grid=(grid,),
            in_specs=[
                pl.BlockSpec((nc, tm), lambda i: (0, i)),   # x^T lane tile
                pl.BlockSpec((nh, nc), lambda i: (0, 0)),   # W1^T (full extent)
                pl.BlockSpec((nh, 1),  lambda i: (0, 0)),   # b1
                pl.BlockSpec((nz, nh), lambda i: (0, 0)),   # W2^T (full extent)
                pl.BlockSpec((nz, 1),  lambda i: (0, 0)),   # b2
            ],
            out_specs=pl.BlockSpec((nz, tm), lambda i: (0, i)),
        ),
        compiler_params=pltpu.CompilerParams(
            dimension_semantics=("parallel",)),
    )(xt, w1t, b1c, w2t, b2c)

    return yt.T                                 # (M, nz) == x.view(-1, nz)


def init_th_encoder_params(key, nz=4, nc=6, nh=12):
    """PyTorch nn.Linear default init: U(-1/sqrt(fan_in), 1/sqrt(fan_in))."""
    k1, k2, k3, k4 = jax.random.split(key, 4)

    def lin(kw, kb, fin, fout):
        bound = 1.0 / (fin ** 0.5)
        w = jax.random.uniform(kw, (fin, fout), jnp.float32, -bound, bound)
        b = jax.random.uniform(kb, (fout,), jnp.float32, -bound, bound)
        return w, b

    w1, b1 = lin(k1, k2, nc, nh)
    w2, b2 = lin(k3, k4, nh, nz)
    return {"w1": w1, "b1": b1, "w2": w2, "b2": b2}


def _reference_forward(params, x):
    nc = params["w1"].shape[0]
    nz = params["w2"].shape[1]
    xf = x.reshape(-1, nc).astype(jnp.float32)
    h = _leaky_relu(xf @ params["w1"] + params["b1"])
    y = _leaky_relu(h @ params["w2"] + params["b2"])
    return y.reshape(-1, nz)


if __name__ == "__main__":
    key = jax.random.PRNGKey(0)
    kp, kx1, kx2 = jax.random.split(key, 3)

    nz, nc = 4, 6
    params = init_th_encoder_params(kp, nz=nz, nc=nc)

    # (batch=2, seq=8, features=nc); forward flattens to (16, nz) via view(-1, nz).
    x = jax.random.normal(kx1, (2, 8, nc), jnp.float32)

    fwd = jax.jit(th_encoder_forward)
    out = jax.block_until_ready(fwd(params, x))
    assert out.shape == (16, nz) and out.dtype == jnp.float32
    ref = _reference_forward(params, x)
    assert jnp.allclose(out, ref, rtol=2e-2, atol=2e-2)

    # Second check: multi-tile grid with a ragged last block (600 rows ->
    # three 256-lane tiles, last one masked on writeback).
    x2 = jax.random.normal(kx2, (600, nc), jnp.float32)
    out2 = jax.block_until_ready(fwd(params, x2))
    ref2 = _reference_forward(params, x2)
    assert out2.shape == (600, nz)
    assert jnp.allclose(out2, ref2, rtol=2e-2, atol=2e-2)

    print("KERNEL_OK")
</pallas_src>

<mosaic_0001>
module attributes {stable_mosaic.version = 11 : i64} {
  func.func @_mlp_kernel(%arg0: i32, %arg1: memref<6x16xf32, #tpu.memory_space<vmem>>, %arg2: memref<12x6xf32, #tpu.memory_space<vmem>>, %arg3: memref<12x1xf32, #tpu.memory_space<vmem>>, %arg4: memref<4x12xf32, #tpu.memory_space<vmem>>, %arg5: memref<4x1xf32, #tpu.memory_space<vmem>>, %arg6: memref<4x16xf32, #tpu.memory_space<vmem>>) attributes {dimension_semantics = [#tpu.dimension_semantics<parallel>], iteration_bounds = array<i64: 1>, scalar_prefetch = 0 : i64, scratch_operands = 0 : i64, tpu.core_type = #tpu.core_type<tc>, window_params = [{transform_indices = @transform_0, window_bounds = array<i64: 6, 16>}, {pipeline_mode = #tpu.pipeline_mode<synchronous>, transform_indices = @transform_1, window_bounds = array<i64: 12, 6>}, {pipeline_mode = #tpu.pipeline_mode<synchronous>, transform_indices = @transform_2, window_bounds = array<i64: 12, 1>}, {pipeline_mode = #tpu.pipeline_mode<synchronous>, transform_indices = @transform_3, window_bounds = array<i64: 4, 12>}, {pipeline_mode = #tpu.pipeline_mode<synchronous>, transform_indices = @transform_4, window_bounds = array<i64: 4, 1>}, {transform_indices = @transform_5, window_bounds = array<i64: 4, 16>}]} {
    %c0 = arith.constant 0 : index
    %c0_0 = arith.constant 0 : index
    %0 = vector.load %arg1[%c0, %c0_0] : memref<6x16xf32, #tpu.memory_space<vmem>>, vector<6x16xf32>
    %c0_1 = arith.constant 0 : index
    %c0_2 = arith.constant 0 : index
    %1 = vector.load %arg2[%c0_1, %c0_2] : memref<12x6xf32, #tpu.memory_space<vmem>>, vector<12x6xf32>
    %cst = arith.constant dense<0.000000e+00> : vector<12x16xf32>
    %2 = tpu.matmul %1, %0, %cst {dimension_numbers = #tpu.dot_dimension_numbers<[1], [0], [0], [1], [0, 0, 1, 1], [], []>} : vector<12x6xf32>, vector<6x16xf32>, vector<12x16xf32> -> vector<12x16xf32>
    %c0_3 = arith.constant 0 : index
    %c0_4 = arith.constant 0 : index
    %3 = vector.load %arg3[%c0_3, %c0_4] : memref<12x1xf32, #tpu.memory_space<vmem>>, vector<12x1xf32>
    %4 = vector.broadcast %3 : vector<12x1xf32> to vector<12x16xf32>
    %5 = arith.addf %2, %4 : vector<12x16xf32>
    %cst_5 = arith.constant 0.000000e+00 : f32
    %6 = vector.broadcast %cst_5 : f32 to vector<12x16xf32>
    %7 = arith.cmpf ogt, %5, %6 : vector<12x16xf32>
    %cst_6 = arith.constant 2.000000e-01 : f32
    %8 = vector.broadcast %cst_6 : f32 to vector<12x16xf32>
    %9 = arith.mulf %8, %5 : vector<12x16xf32>
    %10 = arith.select %7, %5, %9 : vector<12x16xi1>, vector<12x16xf32>
    %c0_7 = arith.constant 0 : index
    %c0_8 = arith.constant 0 : index
    %11 = vector.load %arg4[%c0_7, %c0_8] : memref<4x12xf32, #tpu.memory_space<vmem>>, vector<4x12xf32>
    %cst_9 = arith.constant dense<0.000000e+00> : vector<4x16xf32>
    %12 = tpu.matmul %11, %10, %cst_9 {dimension_numbers = #tpu.dot_dimension_numbers<[1], [0], [0], [1], [0, 0, 1, 1], [], []>} : vector<4x12xf32>, vector<12x16xf32>, vector<4x16xf32> -> vector<4x16xf32>
    %c0_10 = arith.constant 0 : index
    %c0_11 = arith.constant 0 : index
    %13 = vector.load %arg5[%c0_10, %c0_11] : memref<4x1xf32, #tpu.memory_space<vmem>>, vector<4x1xf32>
    %14 = vector.broadcast %13 : vector<4x1xf32> to vector<4x16xf32>
    %15 = arith.addf %12, %14 : vector<4x16xf32>
    %cst_12 = arith.constant 0.000000e+00 : f32
    %16 = vector.broadcast %cst_12 : f32 to vector<4x16xf32>
    %17 = arith.cmpf ogt, %15, %16 : vector<4x16xf32>
    %cst_13 = arith.constant 2.000000e-01 : f32
    %18 = vector.broadcast %cst_13 : f32 to vector<4x16xf32>
    %19 = arith.mulf %18, %15 : vector<4x16xf32>
    %20 = arith.select %17, %15, %19 : vector<4x16xi1>, vector<4x16xf32>
    %c0_14 = arith.constant 0 : index
    %c0_15 = arith.constant 0 : index
    %21 = vector.load %arg6[%c0_14, %c0_15] : memref<4x16xf32, #tpu.memory_space<vmem>>, vector<4x16xf32>
    tpu.vector_store %arg6[%c0_14, %c0_15], %20 {strides = array<i32>} : memref<4x16xf32, #tpu.memory_space<vmem>>, vector<4x16xf32>,
    return
  }
  func.func @transform_0(%arg0: i32) -> (i32, i32) {
    %c0_i32 = arith.constant 0 : i32
    %c0_i32_0 = arith.constant 0 : i32
    return %c0_i32, %arg0 : i32, i32
  }
  func.func @transform_1(%arg0: i32) -> (i32, i32) {
    %c0_i32 = arith.constant 0 : i32
    %c0_i32_0 = arith.constant 0 : i32
    %c0_i32_1 = arith.constant 0 : i32
    return %c0_i32, %c0_i32_0 : i32, i32
  }
  func.func @transform_2(%arg0: i32) -> (i32, i32) {
    %c0_i32 = arith.constant 0 : i32
    %c0_i32_0 = arith.constant 0 : i32
    %c0_i32_1 = arith.constant 0 : i32
    return %c0_i32, %c0_i32_0 : i32, i32
  }
  func.func @transform_3(%arg0: i32) -> (i32, i32) {
    %c0_i32 = arith.constant 0 : i32
    %c0_i32_0 = arith.constant 0 : i32
    %c0_i32_1 = arith.constant 0 : i32
    return %c0_i32, %c0_i32_0 : i32, i32
  }
  func.func @transform_4(%arg0: i32) -> (i32, i32) {
    %c0_i32 = arith.constant 0 : i32
    %c0_i32_0 = arith.constant 0 : i32
    %c0_i32_1 = arith.constant 0 : i32
    return %c0_i32, %c0_i32_0 : i32, i32
  }
  func.func @transform_5(%arg0: i32) -> (i32, i32) {
    %c0_i32 = arith.constant 0 : i32
    %c0_i32_0 = arith.constant 0 : i32
    return %c0_i32, %arg0 : i32, i32
  }
}

</mosaic_0001>

<bundles_post_ra>
// kernel: th_encoder_forward.1
= control target key start
LH: loop header
LB: loop body
LE: loop exit
PB: predicated region body
PF: predicated region fallthrough
CT: control target
= control target key end

     0   :  { %vm43_vm0 = vcmask 1045504   ;;  %vm36_vm1 = vcmask 48128   ;;  %v291_v4 = vmov 0   ;;  %s360_s0 = inlined_call_operand.vmem [shape: f32[6,16], index: 0, kind: input, shape index: {}]   ;;  %s361_s1 = inlined_call_operand.vmem [shape: f32[12,6], index: 1, kind: input, shape index: {}]   ;;  %s362_s2 = inlined_call_operand.vmem [shape: f32[12,1], index: 2, kind: input, shape index: {}]   ;;  %s363_s3 = inlined_call_operand.vmem [shape: f32[4,12], index: 3, kind: input, shape index: {}]   ;;  %s364_s4 = inlined_call_operand.vmem [shape: f32[4,1], index: 4, kind: input, shape index: {}]   ;;  %s365_s5 = inlined_call_operand.hbm [shape: f32[4,16], index: 5, kind: output, shape index: {}]  }
   0x1   :  { %v21_v0 = vld [vmem:[%s360_s0] sm:$0x3f]  ;;  %v23_v2 = vld [vmem:[%s361_s1 + $0x8] sm:$0xf]  ;;  %265 = vset.pattern.permute.xlu0 %v291_v4 }
   0x2   :  { %v22_v1 = vld [vmem:[%s361_s1] sm:$0xff]  ;;  %243 = vmatprep.subr.msk.mxu0 %vm43_vm0, %v21_v0 }
   0x3   :  { %245 = vmatprep.mubr.msk.f32.mxu0 %vm36_vm1, %v22_v1  ;;  %v24_v3 = vld [vmem:[%s362_s2] sm:$0xff]  ;;  %244 = vmatpush3.msk.msra.mxu0 %vm43_vm0, %v21_v0 }
   0x4   :  { %10 = vsyncpa [#allocation3], 0  ;;  %246 = vmatmul.mubr.msk.f32.vlgmr.msra.gmra.mrb[0].mxu0 %vm36_vm1, %v23_v2  ;;  %28 = vperm.xlu0 %265, %v24_v3   ;;  %v25_v5 = vld [vmem:[%s362_s2 + $0x8] sm:$0xf]  ;;  %v292_v6 = vmov 0.0|0.0   ;;  %vm293_vm2 = vmmov 0  }
   0x5   :  { %266 = vset.pattern.permute.xlu1 %v291_v4  ;;  %255 = vmatprep.subr.bf16.mxu1 %v292_v6  ;;  %v294_v7 = vmov 0.0   ;;  %v129_v8 = vld [vmem:[%s364_s4] sm:$0xf]  ;;  %vm139_vm4 = vcmask 1043456   ;;  %vm295_vm6 = vmmov 1   ;;  %vm135_vm8 = vcmask 97280  }
   0x6   :  { %252 = vmatprep.mubr.msk.f32.mxu1 %vm293_vm2, %v294_v7  ;;  %132 = vperm.xlu1 %266, %v129_v8   ;;  %vm257_vm7 = vmpackc.low %vm139_vm4, %vm295_vm6  ;;  %v128_v20 = vld [vmem:[%s363_s3] sm:$0xf]  ;;  %s296_s28 = smov [#allocation2]   ;;  %vm216_vm10 = vcmask 125952  }
   0x7   :  { %s224_s29 = sshll.u32 %s296_s28, 4  ;;  %s225_s29 = int_to_ptr.vmem [resolvable:$true] %s224_s29 }
   0x8   :  { %33 = vperm.xlu0 %265, %v25_v5   ;;  %s267_s30 = scalar_lea.vmem %s225_s29, 64  ;;  %p272_p1 = scmp.lt.s32.totalorder %s225_s29, %s225_s29 }
   0x9   :  { %p268_p0 = scmp.ne.s32.totalorder %s225_s29, %s267_s30  ;;  %p273_p2 = scmp.lt.s32.totalorder %s267_s30, %s267_s30 }
   0xb   :  { %p274_p3 = por %p273_p2, %p272_p1 }
   0xd   :  { %p275_p4 = pnand %p274_p3, %p268_p0 }
  0x83   :  { %v29_v9 = vpop.permute.xlu0 %28 }
  0x85   :  { %v133_v21 = vpop.permute.xlu1 %132 }
  0x87   :  { %v34_v10 = vpop.permute.xlu0 %33 }
  0xd7   :  { %v247_v11 = vpop.f32.mrb[0].mxu0 }
  0xd8   :  { %v119_v12 = vadd.f32 %v247_v11, %v34_v10  ;;  %v113_v13 = vpop.f32.mrb[1].mxu0 }
  0xd9   :  { %v114_v14 = vadd.f32 %v113_v13, %v29_v9 }
  0xda   :  { %vm123_vm3 = vcmp.gt.f32.partialorder %v119_v12, 0.0  ;;  %v125_v15 = vmul.f32 0.2, %v119_v12 }
  0xdb   :  { %vm122_vm5 = vcmp.gt.f32.partialorder %v114_v14, 0.0  ;;  %v124_v16 = vmul.f32 0.2, %v114_v14 }
  0xdc   :  { %v127_v17 = vsel %vm123_vm3, %v119_v12, %v125_v15 }
  0xdd   :  { %v126_v18 = vsel %vm122_vm5, %v114_v14, %v124_v16 }
  0xde   :  { %v256_v19 = vpack.c.bf16 %v127_v17, %v126_v18 }
  0xe0   :  { %258 = vmatpush3.bf16.msk.msra.mxu1 %vm257_vm7, %v256_v19 }
  0xe3   :  { %253 = vmatmul.mubr.msk.f32.vlgmr.msra.gmra.mrb[0].mxu1 %vm135_vm8, %v128_v20 }
 0x1b6   :  { %v209_v22 = vpop.f32.mrb[0].mxu1 }
 0x1b7   :  { %v210_v23 = vadd.f32 %v209_v22, %v133_v21  ;;  %v254_v24 = vpop.f32.mrb[1].mxu1 }
 0x1b9   :  { %v214_v25 = vmul.f32 0.2, %v210_v23  ;;  %vm213_vm9 = vcmp.gt.f32.partialorder %v210_v23, 0.0 }
 0x1bb   :  { %v215_v26 = vsel %vm213_vm9, %v210_v23, %v214_v25 }
 0x1bc   :  { %217 = vst.msk [vmem:[#allocation2] sm:$0xf] %vm216_vm10, %v215_v26 }
 0x1bd   :  { %278 = shalt.err (!%p275_p4)
}
 0x1be   :  { %s279_s7 = scalar_lea.hbm %s365_s5, 64 }
 0x1bf   :  { %p280_p5 = scmp.ne.s32.totalorder %s365_s5, %s279_s7  ;;  %p283_p6 = scmp.lt.u32.totalorder %s279_s7, %s365_s5 }
 0x1c1   :  { %p285_p7 = pnand %p283_p6, %p280_p5 }
 0x1c3   :  { %288 = shalt.err (!%p285_p7)
}
 0x1c4   :  { %227 = dma.vmem_to_hbm [thread:$0]  %s225_s29, 64, %s365_s5, [#allocation3]  }
 0x1c5   :  { %289 = dma.done.wait [#allocation3], 64  }
 0x1c6   :  { %290 = vsyncadd [#allocation3], 4294967232 }
 0x1c7   :  { %231 = vsyncpa [#allocation3], 1 }

</bundles_post_ra>
